<compile_context>
chip_gen: v5e
topology: v5e:2x2
jax: 0.10.0
libtpu: 0.0.40
codegen_flags: <defaults>
</compile_context>

<pallas_src>
import functools
import math

import jax
import jax.numpy as jnp
from jax import lax
from jax.experimental import pallas as pl
from jax.experimental.pallas import tpu as pltpu


_VMEM_LIMIT_BYTES = 48 * 1024 * 1024   # <= v7x's 64 MiB physical VMEM; plenty on v5e/v6e
_TILE_BUDGET_BYTES = 36 * 1024 * 1024  # headroom under the scoped limit for tile planning

_CONTRACT_LAST = (((1,), (1,)), ((), ()))   # A @ B^T (q.k^T pattern; no XLU transpose)


def _tile_plan(n, d, in_bytes, n_masks=0):
    """Largest square sim tile that fits the VMEM budget -> (tile, n_pad, grid_extent).

    Per-grid-step overhead is ~0.35us, so bigger tiles win until VMEM runs out.  For
    n > 1024 the grid extent is always >= 2 so v7x's two TensorCores both get work on
    the "parallel" anchor-row axis.
    """
    def cost(t):
        return (4 * t * d * in_bytes        # double-buffered h1/h2 input tiles
                + 12 * t * t                # sim + exp + misc f32 intermediates
                + n_masks * 6 * t * t)      # mask tiles (double-buffered) + f32 view

    if n <= 1024 and cost(n) <= _TILE_BUDGET_BYTES:
        return n, n, 1                      # single whole-array tile, no padding
    tile = 256
    for t in (1024, 512):
        if cost(t) <= _TILE_BUDGET_BYTES:
            tile = t
            break
    g = -(-n // tile)
    return tile, g * tile, g
    # TODO(synk): very large hidden dims would additionally want a K-blocked matmul.


def _normalize_rows(x):
    # F.normalize(x, dim=-1, eps=1e-12) == x * rsqrt(max(sum(x^2), 1e-24)).
    # The max() keeps all-zero rows (and zero padding rows) exactly zero.
    x = x.astype(jnp.float32)
    ss = jnp.sum(x * x, axis=-1, keepdims=True)
    return x * lax.rsqrt(jnp.maximum(ss, 1e-24))


# ----------------------------------------------------------------------------------------
# Fast path: default SameScaleSampler masks (pos = eye, neg = 1 - eye), both directions
# fused into a single pass over the NxN similarity matrix (sim(h2->h1) = sim(h1->h2)^T).
# ----------------------------------------------------------------------------------------
def _fused_eye_kernel(h1_ref, h2_ref, rowsum_ref, diag_ref, colsum_ref, *, inv_tau):
    i = pl.program_id(0)          # anchor-row tile ("parallel", megacore-sharded)
    j = pl.program_id(1)          # sample-col tile ("arbitrary" / reduction)
    tile = h1_ref.shape[0]

    # cos-sim tile on the MXU; inputs are pre-normalized outside the kernel.
    sim = lax.dot_general(h1_ref[...], h2_ref[...], _CONTRACT_LAST,
                          preferred_element_type=jnp.float32) * inv_tau       # (T, T) f32

    # pos + neg == 1 for eye / (1 - eye), so no mask multiply.  The static shift by 1/tau
    # (cos <= 1) keeps exp <= ~1; the shift is undone in the epilogue.
    e = jnp.exp(sim - inv_tau)

    # Row / column sums as MXU ones-matvecs: keeps the XLU free and the results are
    # lane-dense (1, T) rows -> dense (unmasked) stores into the output blocks.
    ones_row = jnp.ones((1, tile), jnp.float32)
    rsum = lax.dot_general(ones_row, e, _CONTRACT_LAST,
                           preferred_element_type=jnp.float32)                # (1, T_i)
    csum = lax.dot_general(ones_row, e, (((1,), (0,)), ((), ())),
                           preferred_element_type=jnp.float32)                # (1, T_j)

    # Direction-1 denominator: accumulate row sums over the j sweep (resident out block).
    @pl.when(j == 0)
    def _():
        rowsum_ref[...] = jnp.zeros_like(rowsum_ref)
    rowsum_ref[...] += rsum

    # Direction-2 denominator: per-(i, j) column-sum partial, reduced over i in JAX.
    colsum_ref[...] = csum.reshape(colsum_ref.shape)

    # Shared numerator: diagonal of sim, present only on block-diagonal tiles.  The block
    # stays resident across the whole j sweep (j is "arbitrary"), so this single write
    # persists until flush.
    @pl.when(i == j)
    def _():
        eye = (lax.broadcasted_iota(jnp.int32, (tile, tile), 0)
               == lax.broadcasted_iota(jnp.int32, (tile, tile), 1))
        # axis=0 reduce picks sim[c, c] per column -> lane-dense (1, T) result.
        diag_ref[...] = jnp.sum(jnp.where(eye, sim, 0.0), axis=0, keepdims=True)


def _dual_contrast_eye(h1n, h2n, tau, matmul_dtype):
    n, d = h1n.shape
    in_bytes = jnp.dtype(matmul_dtype).itemsize
    tile, n_pad, g = _tile_plan(n, d, in_bytes)
    pad = n_pad - n
    if pad:
        h1n = jnp.pad(h1n, ((0, pad), (0, 0)))
        h2n = jnp.pad(h2n, ((0, pad), (0, 0)))

    inv_tau = 1.0 / float(tau)
    kernel = functools.partial(_fused_eye_kernel, inv_tau=inv_tau)

    cost = pl.CostEstimate(
        flops=int(2 * n_pad * n_pad * (d + 2)),
        transcendentals=int(n_pad * n_pad),
        bytes_accessed=int((1 + g) * n_pad * d * in_bytes + (g + 2) * n_pad * 4))

    rowsum, diag, colsum_p = pl.pallas_call(
        kernel,
        grid=(g, g),
        in_specs=[
            pl.BlockSpec((tile, d), lambda i, j: (i, 0)),        # anchor rows (h1, normed)
            pl.BlockSpec((tile, d), lambda i, j: (j, 0)),        # sample rows (h2, normed)
        ],
        out_specs=[
            pl.BlockSpec((1, tile), lambda i, j: (0, i)),        # rowsum (dir 1), lane-dense
            pl.BlockSpec((1, tile), lambda i, j: (0, i)),        # shared diag, lane-dense
            pl.BlockSpec((1, 1, tile), lambda i, j: (i, 0, j)),  # colsum partials (dir 2)
        ],
        out_shape=[
            jax.ShapeDtypeStruct((1, n_pad), jnp.float32),
            jax.ShapeDtypeStruct((1, n_pad), jnp.float32),
            jax.ShapeDtypeStruct((g, 1, n_pad), jnp.float32),
        ],
        compiler_params=pltpu.CompilerParams(
            dimension_semantics=("parallel", "arbitrary"),
            vmem_limit_bytes=_VMEM_LIMIT_BYTES),
        cost_estimate=cost,
    )(h1n, h2n)

    # O(g*N) epilogue: finish the column reduction, undo the static exp shift, and remove
    # the padding contribution analytically (each zero-padded row/col adds exactly
    # exp(-1/tau) to every valid row/col sum -- no in-kernel pad mask needed).
    diag = diag[0, :n]
    rowsum = rowsum[0, :n]
    colsum = jnp.sum(colsum_p[:, 0, :], axis=0)[:n]
    if pad:
        pad_corr = pad * math.exp(-inv_tau)
        rowsum = rowsum - pad_corr
        colsum = colsum - pad_corr
    l1 = -jnp.mean(diag - (jnp.log(rowsum) + inv_tau))   # anchor = h1, sample = h2
    l2 = -jnp.mean(diag - (jnp.log(colsum) + inv_tau))   # anchor = h2 (sim is transpose)
    return 0.5 * (l1 + l2)


# ----------------------------------------------------------------------------------------
# Slow path: extra_pos_mask / extra_neg_mask supplied.  eye is generated in-kernel; only
# the user-provided extra masks are streamed.  Called once per direction.
# ----------------------------------------------------------------------------------------
def _masked_infonce_kernel(*refs, inv_tau, has_pos, has_neg):
    a_ref, s_ref = refs[0], refs[1]
    k = 2
    pos_ref = neg_ref = None
    if has_pos:
        pos_ref = refs[k]; k += 1
    if has_neg:
        neg_ref = refs[k]; k += 1
    rowsum_ref, possum_ref, pws_ref = refs[k], refs[k + 1], refs[k + 2]

    i = pl.program_id(0)
    j = pl.program_id(1)
    tile = a_ref.shape[0]

    sim = lax.dot_general(a_ref[...], s_ref[...], _CONTRACT_LAST,
                          preferred_element_type=jnp.float32) * inv_tau       # (T, T) f32

    # eye built in-kernel from global indices (never materialized in HBM).
    eyef = ((i * tile + lax.broadcasted_iota(jnp.int32, (tile, tile), 0))
            == (j * tile + lax.broadcasted_iota(jnp.int32, (tile, tile), 1))
            ).astype(jnp.float32)
    if has_pos:
        posf = jnp.maximum(eyef, pos_ref[...].astype(jnp.float32))   # eye OR extra_pos
    else:
        posf = eyef

    e = jnp.exp(sim - inv_tau)
    if has_neg:
        negf = (1.0 - eyef) * neg_ref[...].astype(jnp.float32)       # (1-eye) AND extra_neg
        e = e * (posf + negf)      # weight in {0, 1, 2}: exactly the reference formula
    # else: neg = 1 - pos, so pos + neg == 1 everywhere -> no weighting of exp needed.

    ones_row = jnp.ones((1, tile), jnp.float32)
    rsum = lax.dot_general(ones_row, e, _CONTRACT_LAST,
                           preferred_element_type=jnp.float32)                # (1, T_i)
    psum = lax.dot_general(ones_row, posf, _CONTRACT_LAST,
                           preferred_element_type=jnp.float32)                # (1, T_i)
    pws = lax.dot_general(ones_row, posf * sim, _CONTRACT_LAST,
                          preferred_element_type=jnp.float32)                 # (1, T_i)

    @pl.when(j == 0)
    def _():
        rowsum_ref[...] = jnp.zeros_like(rowsum_ref)
        possum_ref[...] = jnp.zeros_like(possum_ref)
        pws_ref[...] = jnp.zeros_like(pws_ref)
    rowsum_ref[...] += rsum
    possum_ref[...] += psum
    pws_ref[...] += pws


def _infonce_masked(anchor_n, sample_n, extra_pos, extra_neg, tau, matmul_dtype):
    n, d = anchor_n.shape
    has_pos = extra_pos is not None
    has_neg = extra_neg is not None
    in_bytes = jnp.dtype(matmul_dtype).itemsize
    tile, n_pad, g = _tile_plan(n, d, in_bytes, n_masks=int(has_pos) + int(has_neg))
    pad = n_pad - n

    if pad:
        anchor_n = jnp.pad(anchor_n, ((0, pad), (0, 0)))
        sample_n = jnp.pad(sample_n, ((0, pad), (0, 0)))

    # int8 halves mask HBM traffic (matters most on v5e); tiny unaligned single tiles gain
    # nothing from it, so keep those in bf16.
    mask_dtype = jnp.int8 if tile % 32 == 0 else jnp.bfloat16

    inputs = [anchor_n, sample_n]
    in_specs = [pl.BlockSpec((tile, d), lambda i, j: (i, 0)),
                pl.BlockSpec((tile, d), lambda i, j: (j, 0))]
    mask_spec = pl.BlockSpec((tile, tile), lambda i, j: (i, j))
    for m in (extra_pos, extra_neg):
        if m is not None:
            m01 = (jnp.asarray(m) != 0).astype(mask_dtype)    # sanitize to exact 0/1
            if pad:
                m01 = jnp.pad(m01, ((0, pad), (0, pad)))
            inputs.append(m01)
            in_specs.append(mask_spec)
    # TODO(synk): the two directions could share one pass (stream transposed mask tiles and
    # emit column partials like the fast path); kept as two passes for this rare case.

    inv_tau = 1.0 / float(tau)
    kernel = functools.partial(_masked_infonce_kernel, inv_tau=inv_tau,
                               has_pos=has_pos, has_neg=has_neg)

    n_masks = int(has_pos) + int(has_neg)
    cost = pl.CostEstimate(
        flops=int(2 * n_pad * n_pad * (d + 3)),
        transcendentals=int(n_pad * n_pad),
        bytes_accessed=int((1 + g) * n_pad * d * in_bytes
                           + n_masks * n_pad * n_pad * jnp.dtype(mask_dtype).itemsize
                           + 3 * n_pad * 4))

    rowsum, possum, pws = pl.pallas_call(
        kernel,
        grid=(g, g),
        in_specs=in_specs,
        out_specs=[pl.BlockSpec((1, tile), lambda i, j: (0, i))] * 3,   # lane-dense rows
        out_shape=[jax.ShapeDtypeStruct((1, n_pad), jnp.float32)] * 3,
        compiler_params=pltpu.CompilerParams(
            dimension_semantics=("parallel", "arbitrary"),
            vmem_limit_bytes=_VMEM_LIMIT_BYTES),
        cost_estimate=cost,
    )(*inputs)

    rowsum = rowsum[0, :n]
    if pad and not has_neg:
        # Without extra_neg, pos + neg == 1 even for zero-padded sample rows, each of which
        # contributes exactly exp(-1/tau); remove analytically (no in-kernel pad mask).
        rowsum = rowsum - pad * math.exp(-inv_tau)
    possum = possum[0, :n]
    pws = pws[0, :n]
    loss_rows = pws / possum - (jnp.log(rowsum) + inv_tau)
    return -jnp.mean(loss_rows)


# ----------------------------------------------------------------------------------------
# Public entry point (forward of DualBranchContrast in L2L / G2G mode).
# ----------------------------------------------------------------------------------------
def dual_branch_contrast_l2l(h1, h2, *, tau=0.2,
                             extra_pos_mask=None, extra_neg_mask=None,
                             matmul_dtype=jnp.bfloat16):
    """DualBranchContrast(loss=InfoNCE(tau), mode='L2L'/'G2G', intraview_negs=False)."""
    assert h1.ndim == 2 and h1.shape == h2.shape
    # TODO(synk): intraview_negs=True sampler augmentation is not implemented.

    # Hoisted normalization: one tiny N x D pass instead of re-normalizing every tile;
    # the matmul_dtype (bf16 default) cast also halves the re-streamed sample bytes.
    h1n = _normalize_rows(h1).astype(matmul_dtype)
    h2n = _normalize_rows(h2).astype(matmul_dtype)

    if extra_pos_mask is None and extra_neg_mask is None:
        return _dual_contrast_eye(h1n, h2n, tau, matmul_dtype)

    # The PyTorch reference applies the SAME extra masks to both branches.
    l1 = _infonce_masked(h1n, h2n, extra_pos_mask, extra_neg_mask, tau, matmul_dtype)
    l2 = _infonce_masked(h2n, h1n, extra_pos_mask, extra_neg_mask, tau, matmul_dtype)
    return 0.5 * (l1 + l2)


# ----------------------------------------------------------------------------------------
# Pure-JAX reference (mirrors the PyTorch module) + self-test.
# ----------------------------------------------------------------------------------------
def _reference(h1, h2, tau=0.2, extra_pos_mask=None, extra_neg_mask=None):
    def norm(x):
        return x / jnp.maximum(jnp.linalg.norm(x, axis=-1, keepdims=True), 1e-12)

    n = h1.shape[0]
    eye = jnp.eye(n, dtype=jnp.float32)
    pos = eye
    if extra_pos_mask is not None:
        pos = jnp.logical_or(pos.astype(bool), extra_pos_mask.astype(bool)).astype(jnp.float32)
    if extra_neg_mask is not None:
        neg = jnp.logical_and((1.0 - eye).astype(bool),
                              extra_neg_mask.astype(bool)).astype(jnp.float32)
    else:
        neg = 1.0 - pos

    def infonce(a, s):
        sim = jnp.matmul(norm(a), norm(s).T, precision=lax.Precision.HIGHEST) / tau
        exp_sim = jnp.exp(sim) * (pos + neg)
        log_prob = sim - jnp.log(jnp.sum(exp_sim, axis=1, keepdims=True))
        loss = jnp.sum(log_prob * pos, axis=1) / jnp.sum(pos, axis=1)
        return -jnp.mean(loss)

    return (infonce(h1, h2) + infonce(h2, h1)) * 0.5


if __name__ == "__main__":
    key = jax.random.PRNGKey(0)
    k1, k2, k3, k4, k5 = jax.random.split(key, 5)

    # Small shapes consistent with the module: num_nodes=8, hidden=32.
    n, d = 8, 32
    h1 = jax.random.normal(k1, (n, d), dtype=jnp.float32)
    h2 = jax.random.normal(k2, (n, d), dtype=jnp.float32)

    tol = dict(rtol=1e-2, atol=5e-2)  # loss scalar; covers bf16-operand MXU rounding

    # 1) Default fast path (eye masks, fused dual-direction, bf16 MXU operands).
    out = jax.block_until_ready(dual_branch_contrast_l2l(h1, h2, tau=0.2))
    ref = _reference(h1, h2, tau=0.2)
    assert jnp.allclose(out, ref, **tol), (out, ref)

    # 2) Larger, non-tile-aligned size (single whole-array tile path, f32 MXU operands).
    n2 = 300
    g1 = jax.random.normal(k3, (n2, d), dtype=jnp.float32)
    g2 = jax.random.normal(k4, (n2, d), dtype=jnp.float32)
    out2 = jax.block_until_ready(
        dual_branch_contrast_l2l(g1, g2, tau=0.2, matmul_dtype=jnp.float32))
    ref2 = _reference(g1, g2, tau=0.2)
    assert jnp.allclose(out2, ref2, **tol), (out2, ref2)

    # 3) Extra-mask slow path (in-kernel eye, streamed extra-pos mask, one pass/direction).
    extra_pos = jax.random.uniform(k5, (n, n)) > 0.7
    out3 = jax.block_until_ready(
        dual_branch_contrast_l2l(h1, h2, tau=0.2, extra_pos_mask=extra_pos,
                                 matmul_dtype=jnp.float32))
    ref3 = _reference(h1, h2, tau=0.2, extra_pos_mask=extra_pos)
    assert jnp.allclose(out3, ref3, **tol), (out3, ref3)

    print("KERNEL_OK")
</pallas_src>

<mosaic_0001>
module attributes {stable_mosaic.version = 11 : i64} {
  func.func @_fused_eye_kernel(%arg0: i32, %arg1: i32, %arg2: memref<8x32xbf16, #tpu.memory_space<vmem>>, %arg3: memref<8x32xbf16, #tpu.memory_space<vmem>>, %arg4: memref<1x8xf32, #tpu.memory_space<vmem>>, %arg5: memref<1x8xf32, #tpu.memory_space<vmem>>, %arg6: memref<1x1x8xf32, #tpu.memory_space<vmem>>) attributes {dimension_semantics = [#tpu.dimension_semantics<parallel>, #tpu.dimension_semantics<arbitrary>], iteration_bounds = array<i64: 1, 1>, scalar_prefetch = 0 : i64, scratch_operands = 0 : i64, tpu.core_type = #tpu.core_type<tc>, window_params = [{transform_indices = @transform_0, window_bounds = array<i64: 8, 32>}, {transform_indices = @transform_1, window_bounds = array<i64: 8, 32>}, {transform_indices = @transform_2, window_bounds = array<i64: 1, 8>}, {transform_indices = @transform_3, window_bounds = array<i64: 1, 8>}, {transform_indices = @transform_4, window_bounds = array<i64: 1, 1, 8>}]} {
    %c0 = arith.constant 0 : index
    %c0_0 = arith.constant 0 : index
    %0 = vector.load %arg2[%c0, %c0_0] : memref<8x32xbf16, #tpu.memory_space<vmem>>, vector<8x32xbf16>
    %c0_1 = arith.constant 0 : index
    %c0_2 = arith.constant 0 : index
    %1 = vector.load %arg3[%c0_1, %c0_2] : memref<8x32xbf16, #tpu.memory_space<vmem>>, vector<8x32xbf16>
    %cst = arith.constant dense<0.000000e+00> : vector<8x8xf32>
    %2 = tpu.matmul %0, %1, %cst {dimension_numbers = #tpu.dot_dimension_numbers<[1], [1], [0], [0], [0, 0, 1, 0], [], []>} : vector<8x32xbf16>, vector<8x32xbf16>, vector<8x8xf32> -> vector<8x8xf32>
    %cst_3 = arith.constant 5.000000e+00 : f32
    %3 = vector.broadcast %cst_3 : f32 to vector<8x8xf32>
    %4 = arith.mulf %2, %3 : vector<8x8xf32>
    %cst_4 = arith.constant 5.000000e+00 : f32
    %5 = vector.broadcast %cst_4 : f32 to vector<8x8xf32>
    %6 = arith.subf %4, %5 : vector<8x8xf32>
    %7 = math.exp %6 : vector<8x8xf32>
    %cst_5 = arith.constant 1.000000e+00 : f32
    %8 = vector.broadcast %cst_5 : f32 to vector<1x8xf32>
    %cst_6 = arith.constant dense<0.000000e+00> : vector<1x8xf32>
    %9 = tpu.matmul %8, %7, %cst_6 {dimension_numbers = #tpu.dot_dimension_numbers<[1], [1], [0], [0], [0, 0, 1, 0], [], []>} : vector<1x8xf32>, vector<8x8xf32>, vector<1x8xf32> -> vector<1x8xf32>
    %cst_7 = arith.constant dense<0.000000e+00> : vector<1x8xf32>
    %10 = tpu.matmul %8, %7, %cst_7 {dimension_numbers = #tpu.dot_dimension_numbers<[1], [0], [0], [1], [0, 0, 1, 1], [], []>} : vector<1x8xf32>, vector<8x8xf32>, vector<1x8xf32> -> vector<1x8xf32>
    %c0_i32 = arith.constant 0 : i32
    %11 = arith.cmpi eq, %arg1, %c0_i32 : i32
    %12 = arith.extui %11 : i1 to i32
    %c0_i32_8 = arith.constant 0 : i32
    %13 = arith.cmpi ne, %12, %c0_i32_8 : i32
    scf.if %13 {
      %cst_17 = arith.constant 0.000000e+00 : f32
      %22 = vector.broadcast %cst_17 : f32 to vector<1x8xf32>
      %c0_18 = arith.constant 0 : index
      %c0_19 = arith.constant 0 : index
      %23 = vector.load %arg4[%c0_18, %c0_19] : memref<1x8xf32, #tpu.memory_space<vmem>>, vector<1x8xf32>
      tpu.vector_store %arg4[%c0_18, %c0_19], %22 {strides = array<i32>} : memref<1x8xf32, #tpu.memory_space<vmem>>, vector<1x8xf32>,
    } else {
    }
    %c0_9 = arith.constant 0 : index
    %c0_10 = arith.constant 0 : index
    %14 = vector.load %arg4[%c0_9, %c0_10] : memref<1x8xf32, #tpu.memory_space<vmem>>, vector<1x8xf32>
    %15 = arith.addf %14, %9 : vector<1x8xf32>
    %c0_11 = arith.constant 0 : index
    %c0_12 = arith.constant 0 : index
    %16 = vector.load %arg4[%c0_11, %c0_12] : memref<1x8xf32, #tpu.memory_space<vmem>>, vector<1x8xf32>
    tpu.vector_store %arg4[%c0_11, %c0_12], %15 {strides = array<i32>} : memref<1x8xf32, #tpu.memory_space<vmem>>, vector<1x8xf32>,
    %17 = vector.shape_cast %10 : vector<1x8xf32> to vector<1x1x8xf32>
    %c0_13 = arith.constant 0 : index
    %c0_14 = arith.constant 0 : index
    %c0_15 = arith.constant 0 : index
    %18 = vector.load %arg6[%c0_13, %c0_14, %c0_15] : memref<1x1x8xf32, #tpu.memory_space<vmem>>, vector<1x1x8xf32>
    tpu.vector_store %arg6[%c0_13, %c0_14, %c0_15], %17 {strides = array<i32>} : memref<1x1x8xf32, #tpu.memory_space<vmem>>, vector<1x1x8xf32>,
    %19 = arith.cmpi eq, %arg0, %arg1 : i32
    %20 = arith.extui %19 : i1 to i32
    %c0_i32_16 = arith.constant 0 : i32
    %21 = arith.cmpi ne, %20, %c0_i32_16 : i32
    scf.if %21 {
      %22 = tpu.iota {dimensions = array<i32: 0>} : vector<8x8xi32>
      %23 = tpu.iota {dimensions = array<i32: 1>} : vector<8x8xi32>
      %24 = arith.cmpi eq, %22, %23 : vector<8x8xi32>
      %cst_17 = arith.constant 0.000000e+00 : f32
      %25 = vector.broadcast %cst_17 : f32 to vector<8x8xf32>
      %26 = arith.select %24, %4, %25 : vector<8x8xi1>, vector<8x8xf32>
      %cst_18 = arith.constant dense<0.000000e+00> : vector<8xf32>
      %27 = vector.multi_reduction <add>, %26, %cst_18 [0] : vector<8x8xf32> to vector<8xf32>
      %28 = vector.shape_cast %27 : vector<8xf32> to vector<1x8xf32>
      %c0_19 = arith.constant 0 : index
      %c0_20 = arith.constant 0 : index
      %29 = vector.load %arg5[%c0_19, %c0_20] : memref<1x8xf32, #tpu.memory_space<vmem>>, vector<1x8xf32>
      tpu.vector_store %arg5[%c0_19, %c0_20], %28 {strides = array<i32>} : memref<1x8xf32, #tpu.memory_space<vmem>>, vector<1x8xf32>,
    } else {
    }
    return
  }
  func.func @transform_0(%arg0: i32, %arg1: i32) -> (i32, i32) {
    %c0_i32 = arith.constant 0 : i32
    %c0_i32_0 = arith.constant 0 : i32
    return %arg0, %c0_i32 : i32, i32
  }
  func.func @transform_1(%arg0: i32, %arg1: i32) -> (i32, i32) {
    %c0_i32 = arith.constant 0 : i32
    %c0_i32_0 = arith.constant 0 : i32
    return %arg1, %c0_i32 : i32, i32
  }
  func.func @transform_2(%arg0: i32, %arg1: i32) -> (i32, i32) {
    %c0_i32 = arith.constant 0 : i32
    %c0_i32_0 = arith.constant 0 : i32
    return %c0_i32, %arg0 : i32, i32
  }
  func.func @transform_3(%arg0: i32, %arg1: i32) -> (i32, i32) {
    %c0_i32 = arith.constant 0 : i32
    %c0_i32_0 = arith.constant 0 : i32
    return %c0_i32, %arg0 : i32, i32
  }
  func.func @transform_4(%arg0: i32, %arg1: i32) -> (i32, i32, i32) {
    %c0_i32 = arith.constant 0 : i32
    %c0_i32_0 = arith.constant 0 : i32
    return %arg0, %c0_i32, %arg1 : i32, i32, i32
  }
}

</mosaic_0001>

<bundles_post_ra>
// kernel: tpu_custom_call.1
= control target key start
LH: loop header
LB: loop body
LE: loop exit
PB: predicated region body
PF: predicated region fallthrough
CT: control target
= control target key end

     0   :  { %10 = vsyncpa [#allocation3], 0  ;;  %s393_s0 = inlined_call_operand.hbm [shape: bf16[8,32], index: 0, kind: input, shape index: {}]   ;;  %s394_s1 = inlined_call_operand.hbm [shape: bf16[8,32], index: 1, kind: input, shape index: {}]   ;;  %s395_s2 = inlined_call_operand.hbm [shape: f32[1,8], index: 2, kind: output, shape index: {0}]   ;;  %s396_s3 = inlined_call_operand.hbm [shape: f32[1,8], index: 3, kind: output, shape index: {1}]   ;;  %s397_s4 = inlined_call_operand.hbm [shape: f32[1,1,8], index: 4, kind: output, shape index: {2}]  }
   0x1   :  { %11 = vsyncpa [#allocation6], 0 }
   0x2   :  { %12 = vsyncpa [#allocation4], 0 }
   0x3   :  { %13 = vsyncpa [#allocation9], 0  ;;  %s19_s17 = sshll.u32 %s393_s0, 4  ;;  %s338_s18 = smov [#allocation2]   ;;  %s20_s17 = int_to_ptr.hbm [resolvable:$true] %s19_s17 }
   0x4   :  { %s21_s19 = sshll.u32 %s338_s18, 4  ;;  %s30_s22 = sshll.u32 %s394_s1, 4  ;;  %s22_s19 = int_to_ptr.vmem [resolvable:$true] %s21_s19  ;;  %s31_s22 = int_to_ptr.hbm [resolvable:$true] %s30_s22 }
   0x5   :  { %24 = dma.hbm_to_vmem [thread:$0]  %s20_s17, 64, %s22_s19, [#allocation3]  }
   0x6   :  { %s339_s23 = smov [#allocation5]  }
   0x7   :  { %s32_s24 = sshll.u32 %s339_s23, 4  ;;  %s33_s24 = int_to_ptr.vmem [resolvable:$true] %s32_s24 }
   0x8   :  { %35 = dma.hbm_to_vmem [thread:$0]  %s31_s22, 64, %s33_s24, [#allocation6]  }
   0x9   :  { %330 = dma.done.wait [#allocation3], 64  }
   0xa   :  { %331 = vsyncadd [#allocation3], 4294967232 }
   0xb   :  { %332 = dma.done.wait [#allocation6], 64  }
   0xc   :  { %333 = vsyncadd [#allocation6], 4294967232  ;;  %vm47_vm0 = vcmask 261120   ;;  %v46_v0 = vld [vmem:[#allocation5] sm:$0xf]  ;;  %v133_v3 = vlaneseq  ;;  %vm71_vm2 = vcmask 64512  }
   0xd   :  { %v52_v1 = vsel %vm47_vm0, %v46_v0, 0  ;;  %v45_v2 = vld [vmem:[#allocation2] sm:$0xf]  ;;  %vm122_vm3 = vcmask 57344   ;;  %v340_v19 = vmov 1.0   ;;  %s341_s0 = smov [#allocation8]  }
   0xe   :  { %61 = vmatpush.bf16.xpose.msra.mxu0 %v52_v1  ;;  %v134_v4 = vshrl.u32 %v133_v3, 7  ;;  %v136_v5 = vand.u32 127, %v133_v3  ;;  %s163_s1 = sshll.u32 %s341_s0, 4  ;;  %s165_s27 = sshll.u32 %s396_s3, 4  ;;  %v342_v21 = vmov 0.0   ;;  %s164_s1 = int_to_ptr.vmem [resolvable:$true] %s163_s1  ;;  %s166_s27 = int_to_ptr.hbm [resolvable:$true] %s165_s27 }
   0xf   :  { %123 = vst.msk [vmem:[#allocation7] sm:$0x1] %vm122_vm3, %v342_v21  ;;  %s343_s28 = smov [#allocation7]   ;;  %s154_s6 = sshll.u32 %s395_s2, 4  ;;  %s155_s6 = int_to_ptr.hbm [resolvable:$true] %s154_s6 }
  0x10   :  { %vm137_vm1 = vcmp.eq.s32.totalorder %v134_v4, %v136_v5  ;;  %s152_s29 = sshll.u32 %s343_s28, 4  ;;  %s344_s7 = smov [#allocation10]   ;;  %s153_s29 = int_to_ptr.vmem [resolvable:$true] %s152_s29 }
  0x11   :  { %s174_s8 = sshll.u32 %s344_s7, 4  ;;  %s176_s3 = sshll.u32 %s397_s4, 4  ;;  %s175_s8 = int_to_ptr.vmem [resolvable:$true] %s174_s8  ;;  %s177_s3 = int_to_ptr.hbm [resolvable:$true] %s176_s3 }
  0x15   :  { %196 = vmatmul.msk.bf16.vlgmr.msra.gmra.mxu0 %vm47_vm0, %v45_v2 }
  0x16   :  { %v124_v22 = vld [vmem:[#allocation7] sm:$0x1] }
  0x92   :  { %v63_v6 = vpop.f32.mrf.mxu0 }
  0x93   :  { %v67_v7 = vmul.f32 5.0, %v63_v6 }
  0x95   :  { %v197_v8 = vadd.f32 -5.0, %v67_v7  ;;  %v138_v9 = vsel %vm137_vm1, %v67_v7, 0.0 }
  0x96   :  { %v139_v10 = vsel %vm71_vm2, %v138_v9, 0.0 }
  0x97   :  { %v69_v11 = vmul.f32 1.442695, %v197_v8  ;;  %v140_v12 = vrot.slane %v139_v10, 4 }
  0x99   :  { %208 = vpow2.f32 %v69_v11  ;;  %v141_v13 = vadd.f32 %v140_v12, %v139_v10 }
  0x9a   :  { %v65_v14 = vpop.f32.mrf.mxu0 }
  0x9b   :  { %v142_v15 = vrot.slane %v141_v13, 2 }
  0x9d   :  { %v143_v16 = vadd.f32 %v142_v15, %v141_v13 }
  0x9f   :  { %v209_v17 = vpop.eup %208  ;;  %v144_v18 = vrot.slane %v143_v16, 1 }
  0xa0   :  { %198 = vmatpush.xpose.msk.msra.mxu1 %vm71_vm2, %v209_v17  ;;  %113 = vmatpush.msra.mxu2 %v209_v17 }
  0xa1   :  { %200 = vmatmul.msk.f32.vlgmr.msra.gmra.mxu2 %vm71_vm2, %v340_v19  ;;  %v145_v20 = vadd.f32 %v144_v18, %v143_v16 }
  0xa3   :  { %199 = vmatmul.msk.f32.vlgmr.msra.gmra.mxu1 %vm71_vm2, %v340_v19  ;;  %146 = vst.msk [vmem:[#allocation8] sm:$0x1] %vm122_vm3, %v145_v20 }
  0xa4   :  { %168 = dma.vmem_to_hbm [thread:$0]  %s164_s1, 16, %s166_s27, [#allocation9]  }
 0x120   :  { %v95_v23 = vpop.f32.mrf.mxu1 }
 0x121   :  { %v125_v24 = vadd.f32 %v124_v22, %v95_v23 }
 0x123   :  { %127 = vst.msk [vmem:[#allocation7] sm:$0x1] %vm122_vm3, %v125_v24 }
 0x124   :  { %v115_v25 = vpop.f32.mrf.mxu2  ;;  %157 = dma.vmem_to_hbm [thread:$0]  %s153_s29, 16, %s155_s6, [#allocation4]  }
 0x125   :  { %128 = vst.msk [vmem:[#allocation10] sm:$0x1] %vm122_vm3, %v115_v25 }
 0x126   :  { %179 = dma.vmem_to_hbm [thread:$0]  %s175_s8, 16, %s177_s3, [#allocation9]  }
 0x127   :  { %334 = dma.done.wait [#allocation4], 16  }
 0x128   :  { %335 = vsyncadd [#allocation4], 4294967280 }
 0x129   :  { %336 = dma.done.wait [#allocation9], 32  }
 0x12a   :  { %337 = vsyncadd [#allocation9], 4294967264 }
 0x12b   :  { %192 = vsyncpa [#allocation3], 1 }
 0x12c   :  { %193 = vsyncpa [#allocation6], 1 }
 0x12d   :  { %194 = vsyncpa [#allocation4], 1 }
 0x12e   :  { %195 = vsyncpa [#allocation9], 1 }

</bundles_post_ra>
